<compile_context>
chip_gen: v7x
topology: tpu7x:2x2x1
jax: 0.10.0
libtpu: 0.0.40
codegen_flags: <defaults>
</compile_context>

<pallas_src>
import functools

import jax
import jax.numpy as jnp
from jax import lax
from jax.experimental import pallas as pl
from jax.experimental.pallas import tpu as pltpu

_NEG = -1e30  # finite "-inf" sentinel: avoids (-inf) - (-inf) NaNs in the online lse


def _round_up(x, m):
    return ((x + m - 1) // m) * m


def _circle_loss_kernel(ti_ref, tj_ref, flag_ref,              # scalar prefetch (SMEM)
                        e_row_ref, e_col_ref,                  # (TR, D) / (D, TC) embed blocks
                        lab_col_ref, lab_row_ref,              # (TR, 1) / (1, TC) label blocks
                        mp_out, sp_out, mn_out, sn_out,        # (1, 1, 1) per-core partials
                        m_p_ref, s_p_ref, m_n_ref, s_n_ref,    # (1, 1) f32 scratch
                        *, m, gamma, n_valid, tile_r, tile_c):
    c = pl.program_id(0)            # core-split index ("parallel")
    s = pl.program_id(1)            # step within this core's tile-pair list
    n_inner = pl.num_programs(1)
    step = c * n_inner + s          # flat index into the prefetch tables

    @pl.when(s == 0)
    def _init():
        m_p_ref[...] = jnp.full((1, 1), _NEG, jnp.float32)
        m_n_ref[...] = jnp.full((1, 1), _NEG, jnp.float32)
        s_p_ref[...] = jnp.zeros((1, 1), jnp.float32)
        s_n_ref[...] = jnp.zeros((1, 1), jnp.float32)

    flag = flag_ref[step]           # 0 = pure off-diag, 1 = needs masking, 2 = padding step

    # Similarity tile on the MXU, standard (M,K)@(K,N) orientation (no transpose).
    sim = lax.dot_general(e_row_ref[...], e_col_ref[...],
                          (((1,), (0,)), ((), ())),
                          preferred_element_type=jnp.float32)

    # label equality: (TR,1) == (1,TC) -> (TR,TC)
    eq = lab_col_ref[...] == lab_row_ref[...]

    # Fused circle-loss logit: one where-selected scale and offset.
    ap = jnp.maximum((1.0 + m) - sim, 0.0)
    an = jnp.maximum(sim + m, 0.0)
    scale = jnp.where(eq, (-gamma) * ap, gamma * an)
    delta = jnp.where(eq, 1.0 - m, m)
    logit = scale * (sim - delta)

    def accumulate(lg):
        # Streaming (online) logsumexp update for the positive and negative sets.
        # Select-based masking throughout (no mask*exp): at sentinel positions
        # exp(lg - shift) is either 0 (finite shift) or a transient that is
        # annihilated by the exp(m_old - m_new) rescale once a real term appears.
        lp = jnp.where(eq, lg, _NEG)
        ln = jnp.where(eq, _NEG, lg)
        m_p_old = m_p_ref[...]
        m_n_old = m_n_ref[...]
        tmax_p = jnp.max(jnp.max(lp, axis=1, keepdims=True), axis=0, keepdims=True)
        tmax_n = jnp.max(jnp.max(ln, axis=1, keepdims=True), axis=0, keepdims=True)
        m_p_new = jnp.maximum(m_p_old, tmax_p)
        m_n_new = jnp.maximum(m_n_old, tmax_n)
        # positive / negative logits are disjoint by `eq`, so ONE exp serves both.
        shift = jnp.where(eq, m_p_new, m_n_new)
        e_all = jnp.exp(lg - shift)
        sp_t = jnp.sum(jnp.sum(jnp.where(eq, e_all, 0.0), axis=1, keepdims=True),
                       axis=0, keepdims=True)
        sn_t = jnp.sum(jnp.sum(jnp.where(eq, 0.0, e_all), axis=1, keepdims=True),
                       axis=0, keepdims=True)
        s_p_ref[...] = s_p_ref[...] * jnp.exp(m_p_old - m_p_new) + sp_t
        s_n_ref[...] = s_n_ref[...] * jnp.exp(m_n_old - m_n_new) + sn_t
        m_p_ref[...] = m_p_new
        m_n_ref[...] = m_n_new

    @pl.when(flag == 0)
    def _pure_tile():
        # strictly upper & fully valid tile: no triangle / validity masks at all.
        accumulate(logit)

    @pl.when(flag == 1)
    def _masked_tile():
        # diagonal-crossing and/or padded-column tile: triangle + validity test
        # with scalar right-hand sides (no global-coordinate iota adds).
        ti = ti_ref[step]
        tj = tj_ref[step]
        row_off = ti * tile_r - tj * tile_c
        col_lim = n_valid - tj * tile_c
        lr = lax.broadcasted_iota(jnp.int32, (tile_r, tile_c), 0)
        lc = lax.broadcasted_iota(jnp.int32, (tile_r, tile_c), 1)
        upper = jnp.logical_and(lc - lr > row_off, lc < col_lim)
        accumulate(jnp.where(upper, logit, _NEG))

    # flag == 2: core-balancing padding step -> contributes nothing.

    @pl.when(s == n_inner - 1)
    def _finalize():
        mp_out[0] = m_p_ref[...]
        sp_out[0] = s_p_ref[...]
        mn_out[0] = m_n_ref[...]
        sn_out[0] = s_n_ref[...]


def circle_loss_pallas(embeds, labels, m=0.4, gamma=80.0, *,
                       tile_r=None, tile_c=None, use_bf16_matmul=False,
                       num_core_splits=2):
    """embeds: (N, D) float, labels: (N,) int -> scalar float32 loss."""
    n, d = embeds.shape

    # ---- tile selection (rectangular: TR rows x TC cols) --------------------
    if tile_r is None and tile_c is None:
        if n <= 512:
            tile_r = tile_c = _round_up(max(n, 8), 8)       # single tile
        else:
            tile_r, tile_c = 256, 512                       # wide, lane-dense columns
    elif tile_c is None:
        tile_c = tile_r
    elif tile_r is None:
        tile_r = min(tile_c, 256)

    n_pad = _round_up(max(n, tile_c), tile_c)
    assert tile_c % tile_r == 0, "tile_c must be a multiple of tile_r"
    assert tile_r % 8 == 0, "tile_r must be a multiple of 8"
    assert tile_c % 128 == 0 or tile_c == n_pad, \
        "tile_c must be a multiple of 128 or cover the whole (padded) N"

    ratio = tile_c // tile_r
    n_rt = n_pad // tile_r
    n_ct = n_pad // tile_c
    has_pad = n_pad != n

    # ---- enumerate only upper-triangle tile pairs, row-major ----------------
    # Class 1 (needs triangle/validity mask): the diagonal-crossing column tile
    # of each row tile, plus the last column tile when padding exists.  All
    # other pairs are strictly-upper and fully valid -> class 0 (no masks).
    pairs = []
    for i in range(n_rt):
        j0 = i // ratio
        for j in range(j0, n_ct):
            masked = (j == j0) or (has_pad and j == n_ct - 1)
            pairs.append((i, j, 1 if masked else 0))

    nc = max(1, int(num_core_splits))
    steps = -(-len(pairs) // nc)                     # ceil division
    pairs = pairs + [(0, 0, 2)] * (nc * steps - len(pairs))   # flag 2 = no-op step
    ti_arr = jnp.asarray([p[0] for p in pairs], jnp.int32)
    tj_arr = jnp.asarray([p[1] for p in pairs], jnp.int32)
    fl_arr = jnp.asarray([p[2] for p in pairs], jnp.int32)

    # ---- operands ------------------------------------------------------------
    # bf16 matmul inputs are opt-in: gamma=80 amplifies sim rounding inside exp.
    # Consider True for D >= 512 on v6e/v7x after validating tolerances.
    mat_dtype = jnp.bfloat16 if use_bf16_matmul else jnp.float32
    e = jnp.pad(embeds.astype(mat_dtype), ((0, n_pad - n), (0, 0)))
    e_t = e.T                                        # (D, N_pad) column operand
    lab = jnp.pad(labels.astype(jnp.int32), (0, n_pad - n))
    lab_col = lab.reshape(n_pad, 1)
    lab_row = lab.reshape(1, n_pad)

    # ---- VMEM budget (clamped to 32 MiB: legal on v5e/v6e/v7x) ---------------
    itemsize = 2 if use_bf16_matmul else 4
    est = (2 * (tile_r * d + d * tile_c) * itemsize          # double-buffered embed blocks
           + 2 * (tile_r + tile_c) * 4                       # label blocks
           + 12 * tile_r * tile_c * 4                        # elementwise temporaries headroom
           + (1 << 20))
    vmem_limit = min(max(est, 16 << 20), 32 << 20)

    kernel = functools.partial(_circle_loss_kernel, m=float(m), gamma=float(gamma),
                               n_valid=n, tile_r=tile_r, tile_c=tile_c)

    part_shape = jax.ShapeDtypeStruct((nc, 1, 1), jnp.float32)
    part_spec = pl.BlockSpec((1, 1, 1), lambda c, s, ti, tj, fl: (c, 0, 0))

    mp, sp, mn, sn = pl.pallas_call(
        kernel,
        out_shape=(part_shape,) * 4,
        grid_spec=pltpu.PrefetchScalarGridSpec(
            num_scalar_prefetch=3,
            grid=(nc, steps),
            in_specs=[
                # row embed block: index constant across consecutive steps of a
                # row -> Pallas skips its re-DMA.
                pl.BlockSpec((tile_r, d), lambda c, s, ti, tj, fl: (ti[c * steps + s], 0)),
                # pre-transposed column embed block (standard (M,K)@(K,N)).
                pl.BlockSpec((d, tile_c), lambda c, s, ti, tj, fl: (0, tj[c * steps + s])),
                pl.BlockSpec((tile_r, 1), lambda c, s, ti, tj, fl: (ti[c * steps + s], 0)),
                pl.BlockSpec((1, tile_c), lambda c, s, ti, tj, fl: (0, tj[c * steps + s])),
            ],
            out_specs=(part_spec,) * 4,
            scratch_shapes=[pltpu.VMEM((1, 1), jnp.float32)] * 4,
        ),
        # Leading axis is split across TensorCores on v7x (2 TC/chip); on
        # v5e/v6e it just runs the two slices back-to-back on the single TC.
        compiler_params=pltpu.CompilerParams(
            dimension_semantics=("parallel", "arbitrary"),
            vmem_limit_bytes=vmem_limit),
    )(ti_arr, tj_arr, fl_arr, e, e_t, lab_col, lab_row)

    # ---- cross-core LSE merge + softplus (tiny, done in the wrapper) ---------
    def _merge(mv, sv):
        mv = mv[:, 0, 0]
        sv = sv[:, 0, 0]
        mx = jnp.max(mv)
        return mx + jnp.log(jnp.sum(sv * jnp.exp(mv - mx)))

    z = _merge(mp, sp) + _merge(mn, sn)
    return jnp.maximum(z, 0.0) + jnp.log1p(jnp.exp(-jnp.abs(z)))   # stable softplus


def circle_loss_ref(embeds, labels, m=0.4, gamma=80.0):
    """Pure-JAX reference mirroring the PyTorch module (f32-accurate matmul)."""
    sim = jnp.matmul(embeds, embeds.T, precision=lax.Precision.HIGHEST)
    eq = labels[:, None] == labels[None, :]
    n = labels.shape[0]
    upper = jnp.triu(jnp.ones((n, n), dtype=bool), k=1)
    pos = eq & upper
    neg = (~eq) & upper
    ap = jnp.maximum(-sim + 1.0 + m, 0.0)
    an = jnp.maximum(sim + m, 0.0)
    logit_p = jnp.where(pos, -ap * (sim - (1.0 - m)) * gamma, -jnp.inf)
    logit_n = jnp.where(neg, an * (sim - m) * gamma, -jnp.inf)
    z = jax.scipy.special.logsumexp(logit_n) + jax.scipy.special.logsumexp(logit_p)
    return jnp.maximum(z, 0.0) + jnp.log1p(jnp.exp(-jnp.abs(z)))


if __name__ == "__main__":
    key = jax.random.PRNGKey(0)
    k1, k2, k3, k4, k5 = jax.random.split(key, 5)

    # Test 1: tiny single-tile case (module's expected usage: normalized features).
    e1 = jax.random.normal(k1, (8, 32), dtype=jnp.float32)
    e1 = e1 / jnp.linalg.norm(e1, axis=1, keepdims=True)
    l1 = jnp.array([0, 0, 1, 1, 0, 1, 2, 2], dtype=jnp.int32)
    out1 = circle_loss_pallas(e1, l1)
    jax.block_until_ready(out1)
    ref1 = circle_loss_ref(e1, l1)
    assert jnp.allclose(out1, ref1, rtol=5e-4, atol=5e-4), (out1, ref1)

    # Test 2: rectangular multi-tile path with padding (N=200 padded to 256,
    # 64x128 tiles): exercises the masked (triangle + validity) branch.
    e2 = jax.random.normal(k2, (200, 32), dtype=jnp.float32)
    e2 = e2 / jnp.linalg.norm(e2, axis=1, keepdims=True)
    l2 = jax.random.randint(k3, (200,), 0, 8, dtype=jnp.int32)
    out2 = circle_loss_pallas(e2, l2, tile_r=64, tile_c=128)
    jax.block_until_ready(out2)
    ref2 = circle_loss_ref(e2, l2)
    assert jnp.allclose(out2, ref2, rtol=5e-4, atol=5e-4), (out2, ref2)

    # Test 3: no padding (N=256, 64x128 tiles): exercises the specialized pure
    # off-diagonal branch and real work on both core-split slices.
    e3 = jax.random.normal(k4, (256, 32), dtype=jnp.float32)
    e3 = e3 / jnp.linalg.norm(e3, axis=1, keepdims=True)
    l3 = jax.random.randint(k5, (256,), 0, 8, dtype=jnp.int32)
    out3 = circle_loss_pallas(e3, l3, tile_r=64, tile_c=128)
    jax.block_until_ready(out3)
    ref3 = circle_loss_ref(e3, l3)
    assert jnp.allclose(out3, ref3, rtol=5e-4, atol=5e-4), (out3, ref3)

    print("KERNEL_OK")
</pallas_src>

<mosaic_0001>
module attributes {stable_mosaic.version = 11 : i64} {
  func.func @_circle_loss_kernel(%arg0: i32, %arg1: i32, %arg2: memref<2xi32, #tpu.memory_space<smem>>, %arg3: memref<2xi32, #tpu.memory_space<smem>>, %arg4: memref<2xi32, #tpu.memory_space<smem>>, %arg5: memref<8x32xf32, #tpu.memory_space<vmem>>, %arg6: memref<32x8xf32, #tpu.memory_space<vmem>>, %arg7: memref<8x1xi32, #tpu.memory_space<vmem>>, %arg8: memref<1x8xi32, #tpu.memory_space<vmem>>, %arg9: memref<1x1x1xf32, #tpu.memory_space<vmem>>, %arg10: memref<1x1x1xf32, #tpu.memory_space<vmem>>, %arg11: memref<1x1x1xf32, #tpu.memory_space<vmem>>, %arg12: memref<1x1x1xf32, #tpu.memory_space<vmem>>, %arg13: memref<1x1xf32, #tpu.memory_space<vmem>>, %arg14: memref<1x1xf32, #tpu.memory_space<vmem>>, %arg15: memref<1x1xf32, #tpu.memory_space<vmem>>, %arg16: memref<1x1xf32, #tpu.memory_space<vmem>>) attributes {dimension_semantics = [#tpu.dimension_semantics<parallel>, #tpu.dimension_semantics<arbitrary>], iteration_bounds = array<i64: 2, 1>, scalar_prefetch = 3 : i64, scratch_operands = 4 : i64, tpu.core_type = #tpu.core_type<tc>, window_params = [{transform_indices = @transform_0, window_bounds = array<i64: 8, 32>}, {transform_indices = @transform_1, window_bounds = array<i64: 32, 8>}, {transform_indices = @transform_2, window_bounds = array<i64: 8, 1>}, {transform_indices = @transform_3, window_bounds = array<i64: 1, 8>}, {transform_indices = @transform_4, window_bounds = array<i64: 1, 1, 1>}, {transform_indices = @transform_5, window_bounds = array<i64: 1, 1, 1>}, {transform_indices = @transform_6, window_bounds = array<i64: 1, 1, 1>}, {transform_indices = @transform_7, window_bounds = array<i64: 1, 1, 1>}]} {
    %c1_i32 = arith.constant 1 : i32
    %0 = arith.muli %arg0, %c1_i32 : i32
    %1 = arith.addi %0, %arg1 : i32
    %c0_i32 = arith.constant 0 : i32
    %2 = arith.cmpi eq, %arg1, %c0_i32 : i32
    %3 = arith.extui %2 : i1 to i32
    %c0_i32_0 = arith.constant 0 : i32
    %4 = arith.cmpi ne, %3, %c0_i32_0 : i32
    scf.if %4 {
      %cst_22 = arith.constant -1.000000e+30 : f32
      %42 = vector.broadcast %cst_22 : f32 to vector<1x1xf32>
      %c0_23 = arith.constant 0 : index
      %c0_24 = arith.constant 0 : index
      %43 = vector.load %arg13[%c0_23, %c0_24] : memref<1x1xf32, #tpu.memory_space<vmem>>, vector<1x1xf32>
      tpu.vector_store %arg13[%c0_23, %c0_24], %42 {strides = array<i32>} : memref<1x1xf32, #tpu.memory_space<vmem>>, vector<1x1xf32>,
      %cst_25 = arith.constant -1.000000e+30 : f32
      %44 = vector.broadcast %cst_25 : f32 to vector<1x1xf32>
      %c0_26 = arith.constant 0 : index
      %c0_27 = arith.constant 0 : index
      %45 = vector.load %arg15[%c0_26, %c0_27] : memref<1x1xf32, #tpu.memory_space<vmem>>, vector<1x1xf32>
      tpu.vector_store %arg15[%c0_26, %c0_27], %44 {strides = array<i32>} : memref<1x1xf32, #tpu.memory_space<vmem>>, vector<1x1xf32>,
      %cst_28 = arith.constant 0.000000e+00 : f32
      %46 = vector.broadcast %cst_28 : f32 to vector<1x1xf32>
      %c0_29 = arith.constant 0 : index
      %c0_30 = arith.constant 0 : index
      %47 = vector.load %arg14[%c0_29, %c0_30] : memref<1x1xf32, #tpu.memory_space<vmem>>, vector<1x1xf32>
      tpu.vector_store %arg14[%c0_29, %c0_30], %46 {strides = array<i32>} : memref<1x1xf32, #tpu.memory_space<vmem>>, vector<1x1xf32>,
      %cst_31 = arith.constant 0.000000e+00 : f32
      %48 = vector.broadcast %cst_31 : f32 to vector<1x1xf32>
      %c0_32 = arith.constant 0 : index
      %c0_33 = arith.constant 0 : index
      %49 = vector.load %arg16[%c0_32, %c0_33] : memref<1x1xf32, #tpu.memory_space<vmem>>, vector<1x1xf32>
      tpu.vector_store %arg16[%c0_32, %c0_33], %48 {strides = array<i32>} : memref<1x1xf32, #tpu.memory_space<vmem>>, vector<1x1xf32>,
    } else {
    }
    %5 = arith.index_cast %1 : i32 to index
    %6 = memref.load %arg4[%5] : memref<2xi32, #tpu.memory_space<smem>>
    %c0 = arith.constant 0 : index
    %c0_1 = arith.constant 0 : index
    %7 = vector.load %arg5[%c0, %c0_1] : memref<8x32xf32, #tpu.memory_space<vmem>>, vector<8x32xf32>
    %c0_2 = arith.constant 0 : index
    %c0_3 = arith.constant 0 : index
    %8 = vector.load %arg6[%c0_2, %c0_3] : memref<32x8xf32, #tpu.memory_space<vmem>>, vector<32x8xf32>
    %cst = arith.constant dense<0.000000e+00> : vector<8x8xf32>
    %9 = tpu.matmul %7, %8, %cst {dimension_numbers = #tpu.dot_dimension_numbers<[1], [0], [0], [1], [0, 0, 1, 1], [], []>} : vector<8x32xf32>, vector<32x8xf32>, vector<8x8xf32> -> vector<8x8xf32>
    %c0_4 = arith.constant 0 : index
    %c0_5 = arith.constant 0 : index
    %10 = vector.load %arg7[%c0_4, %c0_5] : memref<8x1xi32, #tpu.memory_space<vmem>>, vector<8x1xi32>
    %c0_6 = arith.constant 0 : index
    %c0_7 = arith.constant 0 : index
    %11 = vector.load %arg8[%c0_6, %c0_7] : memref<1x8xi32, #tpu.memory_space<vmem>>, vector<1x8xi32>
    %12 = vector.broadcast %10 : vector<8x1xi32> to vector<8x8xi32>
    %13 = vector.broadcast %11 : vector<1x8xi32> to vector<8x8xi32>
    %14 = arith.cmpi eq, %12, %13 : vector<8x8xi32>
    %cst_8 = arith.constant 1.400000e+00 : f32
    %15 = vector.broadcast %cst_8 : f32 to vector<8x8xf32>
    %16 = arith.subf %15, %9 : vector<8x8xf32>
    %cst_9 = arith.constant 0.000000e+00 : f32
    %17 = vector.broadcast %cst_9 : f32 to vector<8x8xf32>
    %18 = arith.maximumf %16, %17 : vector<8x8xf32>
    %cst_10 = arith.constant 4.000000e-01 : f32
    %19 = vector.broadcast %cst_10 : f32 to vector<8x8xf32>
    %20 = arith.addf %9, %19 : vector<8x8xf32>
    %cst_11 = arith.constant 0.000000e+00 : f32
    %21 = vector.broadcast %cst_11 : f32 to vector<8x8xf32>
    %22 = arith.maximumf %20, %21 : vector<8x8xf32>
    %cst_12 = arith.constant -8.000000e+01 : f32
    %23 = vector.broadcast %cst_12 : f32 to vector<8x8xf32>
    %24 = arith.mulf %23, %18 : vector<8x8xf32>
    %cst_13 = arith.constant 8.000000e+01 : f32
    %25 = vector.broadcast %cst_13 : f32 to vector<8x8xf32>
    %26 = arith.mulf %25, %22 : vector<8x8xf32>
    %27 = arith.select %14, %24, %26 : vector<8x8xi1>, vector<8x8xf32>
    %cst_14 = arith.constant 6.000000e-01 : f32
    %cst_15 = arith.constant 4.000000e-01 : f32
    %28 = vector.broadcast %cst_14 : f32 to vector<8x8xf32>
    %29 = vector.broadcast %cst_15 : f32 to vector<8x8xf32>
    %30 = arith.select %14, %28, %29 : vector<8x8xi1>, vector<8x8xf32>
    %31 = arith.subf %9, %30 : vector<8x8xf32>
    %32 = arith.mulf %27, %31 : vector<8x8xf32>
    %c0_i32_16 = arith.constant 0 : i32
    %33 = arith.cmpi eq, %6, %c0_i32_16 : i32
    %34 = arith.extui %33 : i1 to i32
    %c0_i32_17 = arith.constant 0 : i32
    %35 = arith.cmpi ne, %34, %c0_i32_17 : i32
    scf.if %35 {
      %cst_22 = arith.constant -1.000000e+30 : f32
      %42 = vector.broadcast %cst_22 : f32 to vector<8x8xf32>
      %43 = arith.select %14, %32, %42 : vector<8x8xi1>, vector<8x8xf32>
      %cst_23 = arith.constant -1.000000e+30 : f32
      %44 = vector.broadcast %cst_23 : f32 to vector<8x8xf32>
      %45 = arith.select %14, %44, %32 : vector<8x8xi1>, vector<8x8xf32>
      %c0_24 = arith.constant 0 : index
      %c0_25 = arith.constant 0 : index
      %46 = vector.load %arg13[%c0_24, %c0_25] : memref<1x1xf32, #tpu.memory_space<vmem>>, vector<1x1xf32>
      %c0_26 = arith.constant 0 : index
      %c0_27 = arith.constant 0 : index
      %47 = vector.load %arg15[%c0_26, %c0_27] : memref<1x1xf32, #tpu.memory_space<vmem>>, vector<1x1xf32>
      %cst_28 = arith.constant dense<0xFF800000> : vector<8xf32>
      %48 = vector.multi_reduction <maximumf>, %43, %cst_28 [1] : vector<8x8xf32> to vector<8xf32>
      %49 = vector.shape_cast %48 : vector<8xf32> to vector<8x1xf32>
      %cst_29 = arith.constant dense<0xFF800000> : vector<1xf32>
      %50 = vector.multi_reduction <maximumf>, %49, %cst_29 [0] : vector<8x1xf32> to vector<1xf32>
      %51 = vector.shape_cast %50 : vector<1xf32> to vector<1x1xf32>
      %cst_30 = arith.constant dense<0xFF800000> : vector<8xf32>
      %52 = vector.multi_reduction <maximumf>, %45, %cst_30 [1] : vector<8x8xf32> to vector<8xf32>
      %53 = vector.shape_cast %52 : vector<8xf32> to vector<8x1xf32>
      %cst_31 = arith.constant dense<0xFF800000> : vector<1xf32>
      %54 = vector.multi_reduction <maximumf>, %53, %cst_31 [0] : vector<8x1xf32> to vector<1xf32>
      %55 = vector.shape_cast %54 : vector<1xf32> to vector<1x1xf32>
      %56 = arith.maximumf %46, %51 : vector<1x1xf32>
      %57 = arith.maximumf %47, %55 : vector<1x1xf32>
      %58 = vector.shape_cast %56 : vector<1x1xf32> to vector<1x1xf32>
      %59 = vector.broadcast %58 : vector<1x1xf32> to vector<8x8xf32>
      %60 = vector.shape_cast %57 : vector<1x1xf32> to vector<1x1xf32>
      %61 = vector.broadcast %60 : vector<1x1xf32> to vector<8x8xf32>
      %62 = arith.select %14, %59, %61 : vector<8x8xi1>, vector<8x8xf32>
      %63 = arith.subf %32, %62 : vector<8x8xf32>
      %64 = math.exp %63 : vector<8x8xf32>
      %cst_32 = arith.constant 0.000000e+00 : f32
      %65 = vector.broadcast %cst_32 : f32 to vector<8x8xf32>
      %66 = arith.select %14, %64, %65 : vector<8x8xi1>, vector<8x8xf32>
      %cst_33 = arith.constant dense<0.000000e+00> : vector<8xf32>
      %67 = vector.multi_reduction <add>, %66, %cst_33 [1] : vector<8x8xf32> to vector<8xf32>
      %68 = vector.shape_cast %67 : vector<8xf32> to vector<8x1xf32>
      %cst_34 = arith.constant dense<0.000000e+00> : vector<1xf32>
      %69 = vector.multi_reduction <add>, %68, %cst_34 [0] : vector<8x1xf32> to vector<1xf32>
      %70 = vector.shape_cast %69 : vector<1xf32> to vector<1x1xf32>
      %cst_35 = arith.constant 0.000000e+00 : f32
      %71 = vector.broadcast %cst_35 : f32 to vector<8x8xf32>
      %72 = arith.select %14, %71, %64 : vector<8x8xi1>, vector<8x8xf32>
      %cst_36 = arith.constant dense<0.000000e+00> : vector<8xf32>
      %73 = vector.multi_reduction <add>, %72, %cst_36 [1] : vector<8x8xf32> to vector<8xf32>
      %74 = vector.shape_cast %73 : vector<8xf32> to vector<8x1xf32>
      %cst_37 = arith.constant dense<0.000000e+00> : vector<1xf32>
      %75 = vector.multi_reduction <add>, %74, %cst_37 [0] : vector<8x1xf32> to vector<1xf32>
      %76 = vector.shape_cast %75 : vector<1xf32> to vector<1x1xf32>
      %c0_38 = arith.constant 0 : index
      %c0_39 = arith.constant 0 : index
      %77 = vector.load %arg14[%c0_38, %c0_39] : memref<1x1xf32, #tpu.memory_space<vmem>>, vector<1x1xf32>
      %78 = arith.subf %46, %56 : vector<1x1xf32>
      %79 = math.exp %78 : vector<1x1xf32>
      %80 = arith.mulf %77, %79 : vector<1x1xf32>
      %81 = arith.addf %80, %70 : vector<1x1xf32>
      %c0_40 = arith.constant 0 : index
      %c0_41 = arith.constant 0 : index
      %82 = vector.load %arg14[%c0_40, %c0_41] : memref<1x1xf32, #tpu.memory_space<vmem>>, vector<1x1xf32>
      tpu.vector_store %arg14[%c0_40, %c0_41], %81 {strides = array<i32>} : memref<1x1xf32, #tpu.memory_space<vmem>>, vector<1x1xf32>,
      %c0_42 = arith.constant 0 : index
      %c0_43 = arith.constant 0 : index
      %83 = vector.load %arg16[%c0_42, %c0_43] : memref<1x1xf32, #tpu.memory_space<vmem>>, vector<1x1xf32>
      %84 = arith.subf %47, %57 : vector<1x1xf32>
      %85 = math.exp %84 : vector<1x1xf32>
      %86 = arith.mulf %83, %85 : vector<1x1xf32>
      %87 = arith.addf %86, %76 : vector<1x1xf32>
      %c0_44 = arith.constant 0 : index
      %c0_45 = arith.constant 0 : index
      %88 = vector.load %arg16[%c0_44, %c0_45] : memref<1x1xf32, #tpu.memory_space<vmem>>, vector<1x1xf32>
      tpu.vector_store %arg16[%c0_44, %c0_45], %87 {strides = array<i32>} : memref<1x1xf32, #tpu.memory_space<vmem>>, vector<1x1xf32>,
      %c0_46 = arith.constant 0 : index
      %c0_47 = arith.constant 0 : index
      %89 = vector.load %arg13[%c0_46, %c0_47] : memref<1x1xf32, #tpu.memory_space<vmem>>, vector<1x1xf32>
      tpu.vector_store %arg13[%c0_46, %c0_47], %56 {strides = array<i32>} : memref<1x1xf32, #tpu.memory_space<vmem>>, vector<1x1xf32>,
      %c0_48 = arith.constant 0 : index
      %c0_49 = arith.constant 0 : index
      %90 = vector.load %arg15[%c0_48, %c0_49] : memref<1x1xf32, #tpu.memory_space<vmem>>, vector<1x1xf32>
      tpu.vector_store %arg15[%c0_48, %c0_49], %57 {strides = array<i32>} : memref<1x1xf32, #tpu.memory_space<vmem>>, vector<1x1xf32>,
    } else {
    }
    %c1_i32_18 = arith.constant 1 : i32
    %36 = arith.cmpi eq, %6, %c1_i32_18 : i32
    %37 = arith.extui %36 : i1 to i32
    %c0_i32_19 = arith.constant 0 : i32
    %38 = arith.cmpi ne, %37, %c0_i32_19 : i32
    scf.if %38 {
      %42 = arith.index_cast %1 : i32 to index
      %43 = memref.load %arg2[%42] : memref<2xi32, #tpu.memory_space<smem>>
      %44 = arith.index_cast %1 : i32 to index
      %45 = memref.load %arg3[%44] : memref<2xi32, #tpu.memory_space<smem>>
      %c8_i32 = arith.constant 8 : i32
      %46 = arith.muli %43, %c8_i32 : i32
      %c8_i32_22 = arith.constant 8 : i32
      %47 = arith.muli %45, %c8_i32_22 : i32
      %48 = arith.subi %46, %47 : i32
      %c8_i32_23 = arith.constant 8 : i32
      %49 = arith.muli %45, %c8_i32_23 : i32
      %c8_i32_24 = arith.constant 8 : i32
      %50 = arith.subi %c8_i32_24, %49 : i32
      %51 = tpu.iota {dimensions = array<i32: 0>} : vector<8x8xi32>
      %52 = tpu.iota {dimensions = array<i32: 1>} : vector<8x8xi32>
      %53 = arith.subi %52, %51 : vector<8x8xi32>
      %54 = vector.broadcast %48 : i32 to vector<8x8xi32>
      %55 = arith.cmpi sgt, %53, %54 : vector<8x8xi32>
      %56 = vector.broadcast %50 : i32 to vector<8x8xi32>
      %57 = arith.cmpi slt, %52, %56 : vector<8x8xi32>
      %58 = arith.andi %55, %57 : vector<8x8xi1>
      %cst_25 = arith.constant -1.000000e+30 : f32
      %59 = vector.broadcast %cst_25 : f32 to vector<8x8xf32>
      %60 = arith.select %58, %32, %59 : vector<8x8xi1>, vector<8x8xf32>
      %cst_26 = arith.constant -1.000000e+30 : f32
      %61 = vector.broadcast %cst_26 : f32 to vector<8x8xf32>
      %62 = arith.select %14, %60, %61 : vector<8x8xi1>, vector<8x8xf32>
      %cst_27 = arith.constant -1.000000e+30 : f32
      %63 = vector.broadcast %cst_27 : f32 to vector<8x8xf32>
      %64 = arith.select %14, %63, %60 : vector<8x8xi1>, vector<8x8xf32>
      %c0_28 = arith.constant 0 : index
      %c0_29 = arith.constant 0 : index
      %65 = vector.load %arg13[%c0_28, %c0_29] : memref<1x1xf32, #tpu.memory_space<vmem>>, vector<1x1xf32>
      %c0_30 = arith.constant 0 : index
      %c0_31 = arith.constant 0 : index
      %66 = vector.load %arg15[%c0_30, %c0_31] : memref<1x1xf32, #tpu.memory_space<vmem>>, vector<1x1xf32>
      %cst_32 = arith.constant dense<0xFF800000> : vector<8xf32>
      %67 = vector.multi_reduction <maximumf>, %62, %cst_32 [1] : vector<8x8xf32> to vector<8xf32>
      %68 = vector.shape_cast %67 : vector<8xf32> to vector<8x1xf32>
      %cst_33 = arith.constant dense<0xFF800000> : vector<1xf32>
      %69 = vector.multi_reduction <maximumf>, %68, %cst_33 [0] : vector<8x1xf32> to vector<1xf32>
      %70 = vector.shape_cast %69 : vector<1xf32> to vector<1x1xf32>
      %cst_34 = arith.constant dense<0xFF800000> : vector<8xf32>
      %71 = vector.multi_reduction <maximumf>, %64, %cst_34 [1] : vector<8x8xf32> to vector<8xf32>
      %72 = vector.shape_cast %71 : vector<8xf32> to vector<8x1xf32>
      %cst_35 = arith.constant dense<0xFF800000> : vector<1xf32>
      %73 = vector.multi_reduction <maximumf>, %72, %cst_35 [0] : vector<8x1xf32> to vector<1xf32>
      %74 = vector.shape_cast %73 : vector<1xf32> to vector<1x1xf32>
      %75 = arith.maximumf %65, %70 : vector<1x1xf32>
      %76 = arith.maximumf %66, %74 : vector<1x1xf32>
      %77 = vector.shape_cast %75 : vector<1x1xf32> to vector<1x1xf32>
      %78 = vector.broadcast %77 : vector<1x1xf32> to vector<8x8xf32>
      %79 = vector.shape_cast %76 : vector<1x1xf32> to vector<1x1xf32>
      %80 = vector.broadcast %79 : vector<1x1xf32> to vector<8x8xf32>
      %81 = arith.select %14, %78, %80 : vector<8x8xi1>, vector<8x8xf32>
      %82 = arith.subf %60, %81 : vector<8x8xf32>
      %83 = math.exp %82 : vector<8x8xf32>
      %cst_36 = arith.constant 0.000000e+00 : f32
      %84 = vector.broadcast %cst_36 : f32 to vector<8x8xf32>
      %85 = arith.select %14, %83, %84 : vector<8x8xi1>, vector<8x8xf32>
      %cst_37 = arith.constant dense<0.000000e+00> : vector<8xf32>
      %86 = vector.multi_reduction <add>, %85, %cst_37 [1] : vector<8x8xf32> to vector<8xf32>
      %87 = vector.shape_cast %86 : vector<8xf32> to vector<8x1xf32>
      %cst_38 = arith.constant dense<0.000000e+00> : vector<1xf32>
      %88 = vector.multi_reduction <add>, %87, %cst_38 [0] : vector<8x1xf32> to vector<1xf32>
      %89 = vector.shape_cast %88 : vector<1xf32> to vector<1x1xf32>
      %cst_39 = arith.constant 0.000000e+00 : f32
      %90 = vector.broadcast %cst_39 : f32 to vector<8x8xf32>
      %91 = arith.select %14, %90, %83 : vector<8x8xi1>, vector<8x8xf32>
      %cst_40 = arith.constant dense<0.000000e+00> : vector<8xf32>
      %92 = vector.multi_reduction <add>, %91, %cst_40 [1] : vector<8x8xf32> to vector<8xf32>
      %93 = vector.shape_cast %92 : vector<8xf32> to vector<8x1xf32>
      %cst_41 = arith.constant dense<0.000000e+00> : vector<1xf32>
      %94 = vector.multi_reduction <add>, %93, %cst_41 [0] : vector<8x1xf32> to vector<1xf32>
      %95 = vector.shape_cast %94 : vector<1xf32> to vector<1x1xf32>
      %c0_42 = arith.constant 0 : index
      %c0_43 = arith.constant 0 : index
      %96 = vector.load %arg14[%c0_42, %c0_43] : memref<1x1xf32, #tpu.memory_space<vmem>>, vector<1x1xf32>
      %97 = arith.subf %65, %75 : vector<1x1xf32>
      %98 = math.exp %97 : vector<1x1xf32>
      %99 = arith.mulf %96, %98 : vector<1x1xf32>
      %100 = arith.addf %99, %89 : vector<1x1xf32>
      %c0_44 = arith.constant 0 : index
      %c0_45 = arith.constant 0 : index
      %101 = vector.load %arg14[%c0_44, %c0_45] : memref<1x1xf32, #tpu.memory_space<vmem>>, vector<1x1xf32>
      tpu.vector_store %arg14[%c0_44, %c0_45], %100 {strides = array<i32>} : memref<1x1xf32, #tpu.memory_space<vmem>>, vector<1x1xf32>,
      %c0_46 = arith.constant 0 : index
      %c0_47 = arith.constant 0 : index
      %102 = vector.load %arg16[%c0_46, %c0_47] : memref<1x1xf32, #tpu.memory_space<vmem>>, vector<1x1xf32>
      %103 = arith.subf %66, %76 : vector<1x1xf32>
      %104 = math.exp %103 : vector<1x1xf32>
      %105 = arith.mulf %102, %104 : vector<1x1xf32>
      %106 = arith.addf %105, %95 : vector<1x1xf32>
      %c0_48 = arith.constant 0 : index
      %c0_49 = arith.constant 0 : index
      %107 = vector.load %arg16[%c0_48, %c0_49] : memref<1x1xf32, #tpu.memory_space<vmem>>, vector<1x1xf32>
      tpu.vector_store %arg16[%c0_48, %c0_49], %106 {strides = array<i32>} : memref<1x1xf32, #tpu.memory_space<vmem>>, vector<1x1xf32>,
      %c0_50 = arith.constant 0 : index
      %c0_51 = arith.constant 0 : index
      %108 = vector.load %arg13[%c0_50, %c0_51] : memref<1x1xf32, #tpu.memory_space<vmem>>, vector<1x1xf32>
      tpu.vector_store %arg13[%c0_50, %c0_51], %75 {strides = array<i32>} : memref<1x1xf32, #tpu.memory_space<vmem>>, vector<1x1xf32>,
      %c0_52 = arith.constant 0 : index
      %c0_53 = arith.constant 0 : index
      %109 = vector.load %arg15[%c0_52, %c0_53] : memref<1x1xf32, #tpu.memory_space<vmem>>, vector<1x1xf32>
      tpu.vector_store %arg15[%c0_52, %c0_53], %76 {strides = array<i32>} : memref<1x1xf32, #tpu.memory_space<vmem>>, vector<1x1xf32>,
    } else {
    }
    %c0_i32_20 = arith.constant 0 : i32
    %39 = arith.cmpi eq, %arg1, %c0_i32_20 : i32
    %40 = arith.extui %39 : i1 to i32
    %c0_i32_21 = arith.constant 0 : i32
    %41 = arith.cmpi ne, %40, %c0_i32_21 : i32
    scf.if %41 {
      %c0_22 = arith.constant 0 : index
      %c0_23 = arith.constant 0 : index
      %42 = vector.load %arg13[%c0_22, %c0_23] : memref<1x1xf32, #tpu.memory_space<vmem>>, vector<1x1xf32>
      %c0_24 = arith.constant 0 : index
      %c0_25 = arith.constant 0 : index
      %c0_26 = arith.constant 0 : index
      %43 = vector.load %arg9[%c0_24, %c0_25, %c0_26] : memref<1x1x1xf32, #tpu.memory_space<vmem>>, vector<1x1x1xf32>
      %44 = vector.shape_cast %43 : vector<1x1x1xf32> to vector<1x1xf32>
      %45 = vector.shape_cast %42 : vector<1x1xf32> to vector<1x1x1xf32>
      tpu.vector_store %arg9[%c0_24, %c0_25, %c0_26], %45 {strides = array<i32>} : memref<1x1x1xf32, #tpu.memory_space<vmem>>, vector<1x1x1xf32>,
      %c0_27 = arith.constant 0 : index
      %c0_28 = arith.constant 0 : index
      %46 = vector.load %arg14[%c0_27, %c0_28] : memref<1x1xf32, #tpu.memory_space<vmem>>, vector<1x1xf32>
      %c0_29 = arith.constant 0 : index
      %c0_30 = arith.constant 0 : index
      %c0_31 = arith.constant 0 : index
      %47 = vector.load %arg10[%c0_29, %c0_30, %c0_31] : memref<1x1x1xf32, #tpu.memory_space<vmem>>, vector<1x1x1xf32>
      %48 = vector.shape_cast %47 : vector<1x1x1xf32> to vector<1x1xf32>
      %49 = vector.shape_cast %46 : vector<1x1xf32> to vector<1x1x1xf32>
      tpu.vector_store %arg10[%c0_29, %c0_30, %c0_31], %49 {strides = array<i32>} : memref<1x1x1xf32, #tpu.memory_space<vmem>>, vector<1x1x1xf32>,
      %c0_32 = arith.constant 0 : index
      %c0_33 = arith.constant 0 : index
      %50 = vector.load %arg15[%c0_32, %c0_33] : memref<1x1xf32, #tpu.memory_space<vmem>>, vector<1x1xf32>
      %c0_34 = arith.constant 0 : index
      %c0_35 = arith.constant 0 : index
      %c0_36 = arith.constant 0 : index
      %51 = vector.load %arg11[%c0_34, %c0_35, %c0_36] : memref<1x1x1xf32, #tpu.memory_space<vmem>>, vector<1x1x1xf32>
      %52 = vector.shape_cast %51 : vector<1x1x1xf32> to vector<1x1xf32>
      %53 = vector.shape_cast %50 : vector<1x1xf32> to vector<1x1x1xf32>
      tpu.vector_store %arg11[%c0_34, %c0_35, %c0_36], %53 {strides = array<i32>} : memref<1x1x1xf32, #tpu.memory_space<vmem>>, vector<1x1x1xf32>,
      %c0_37 = arith.constant 0 : index
      %c0_38 = arith.constant 0 : index
      %54 = vector.load %arg16[%c0_37, %c0_38] : memref<1x1xf32, #tpu.memory_space<vmem>>, vector<1x1xf32>
      %c0_39 = arith.constant 0 : index
      %c0_40 = arith.constant 0 : index
      %c0_41 = arith.constant 0 : index
      %55 = vector.load %arg12[%c0_39, %c0_40, %c0_41] : memref<1x1x1xf32, #tpu.memory_space<vmem>>, vector<1x1x1xf32>
      %56 = vector.shape_cast %55 : vector<1x1x1xf32> to vector<1x1xf32>
      %57 = vector.shape_cast %54 : vector<1x1xf32> to vector<1x1x1xf32>
      tpu.vector_store %arg12[%c0_39, %c0_40, %c0_41], %57 {strides = array<i32>} : memref<1x1x1xf32, #tpu.memory_space<vmem>>, vector<1x1x1xf32>,
    } else {
    }
    return
  }
  func.func @transform_0(%arg0: i32, %arg1: i32, %arg2: memref<2xi32, #tpu.memory_space<smem>>, %arg3: memref<2xi32, #tpu.memory_space<smem>>, %arg4: memref<2xi32, #tpu.memory_space<smem>>) -> (i32, i32) {
    %c1_i32 = arith.constant 1 : i32
    %0 = arith.muli %arg0, %c1_i32 : i32
    %1 = arith.addi %0, %arg1 : i32
    %2 = arith.index_cast %1 : i32 to index
    %3 = memref.load %arg2[%2] : memref<2xi32, #tpu.memory_space<smem>>
    %c0_i32 = arith.constant 0 : i32
    %c0_i32_0 = arith.constant 0 : i32
    return %3, %c0_i32 : i32, i32
  }
  func.func @transform_1(%arg0: i32, %arg1: i32, %arg2: memref<2xi32, #tpu.memory_space<smem>>, %arg3: memref<2xi32, #tpu.memory_space<smem>>, %arg4: memref<2xi32, #tpu.memory_space<smem>>) -> (i32, i32) {
    %c1_i32 = arith.constant 1 : i32
    %0 = arith.muli %arg0, %c1_i32 : i32
    %1 = arith.addi %0, %arg1 : i32
    %2 = arith.index_cast %1 : i32 to index
    %3 = memref.load %arg3[%2] : memref<2xi32, #tpu.memory_space<smem>>
    %c0_i32 = arith.constant 0 : i32
    %c0_i32_0 = arith.constant 0 : i32
    return %c0_i32, %3 : i32, i32
  }
  func.func @transform_2(%arg0: i32, %arg1: i32, %arg2: memref<2xi32, #tpu.memory_space<smem>>, %arg3: memref<2xi32, #tpu.memory_space<smem>>, %arg4: memref<2xi32, #tpu.memory_space<smem>>) -> (i32, i32) {
    %c1_i32 = arith.constant 1 : i32
    %0 = arith.muli %arg0, %c1_i32 : i32
    %1 = arith.addi %0, %arg1 : i32
    %2 = arith.index_cast %1 : i32 to index
    %3 = memref.load %arg2[%2] : memref<2xi32, #tpu.memory_space<smem>>
    %c0_i32 = arith.constant 0 : i32
    %c0_i32_0 = arith.constant 0 : i32
    return %3, %c0_i32 : i32, i32
  }
  func.func @transform_3(%arg0: i32, %arg1: i32, %arg2: memref<2xi32, #tpu.memory_space<smem>>, %arg3: memref<2xi32, #tpu.memory_space<smem>>, %arg4: memref<2xi32, #tpu.memory_space<smem>>) -> (i32, i32) {
    %c1_i32 = arith.constant 1 : i32
    %0 = arith.muli %arg0, %c1_i32 : i32
    %1 = arith.addi %0, %arg1 : i32
    %2 = arith.index_cast %1 : i32 to index
    %3 = memref.load %arg3[%2] : memref<2xi32, #tpu.memory_space<smem>>
    %c0_i32 = arith.constant 0 : i32
    %c0_i32_0 = arith.constant 0 : i32
    return %c0_i32, %3 : i32, i32
  }
  func.func @transform_4(%arg0: i32, %arg1: i32, %arg2: memref<2xi32, #tpu.memory_space<smem>>, %arg3: memref<2xi32, #tpu.memory_space<smem>>, %arg4: memref<2xi32, #tpu.memory_space<smem>>) -> (i32, i32, i32) {
    %c0_i32 = arith.constant 0 : i32
    %c0_i32_0 = arith.constant 0 : i32
    %c0_i32_1 = arith.constant 0 : i32
    return %arg0, %c0_i32, %c0_i32_0 : i32, i32, i32
  }
  func.func @transform_5(%arg0: i32, %arg1: i32, %arg2: memref<2xi32, #tpu.memory_space<smem>>, %arg3: memref<2xi32, #tpu.memory_space<smem>>, %arg4: memref<2xi32, #tpu.memory_space<smem>>) -> (i32, i32, i32) {
    %c0_i32 = arith.constant 0 : i32
    %c0_i32_0 = arith.constant 0 : i32
    %c0_i32_1 = arith.constant 0 : i32
    return %arg0, %c0_i32, %c0_i32_0 : i32, i32, i32
  }
  func.func @transform_6(%arg0: i32, %arg1: i32, %arg2: memref<2xi32, #tpu.memory_space<smem>>, %arg3: memref<2xi32, #tpu.memory_space<smem>>, %arg4: memref<2xi32, #tpu.memory_space<smem>>) -> (i32, i32, i32) {
    %c0_i32 = arith.constant 0 : i32
    %c0_i32_0 = arith.constant 0 : i32
    %c0_i32_1 = arith.constant 0 : i32
    return %arg0, %c0_i32, %c0_i32_0 : i32, i32, i32
  }
  func.func @transform_7(%arg0: i32, %arg1: i32, %arg2: memref<2xi32, #tpu.memory_space<smem>>, %arg3: memref<2xi32, #tpu.memory_space<smem>>, %arg4: memref<2xi32, #tpu.memory_space<smem>>) -> (i32, i32, i32) {
    %c0_i32 = arith.constant 0 : i32
    %c0_i32_0 = arith.constant 0 : i32
    %c0_i32_1 = arith.constant 0 : i32
    return %arg0, %c0_i32, %c0_i32_0 : i32, i32, i32
  }
}

</mosaic_0001>

<bundles_post_ra>
// kernel: tpu_custom_call.1
= control target key start
LH: loop header
LB: loop body
LE: loop exit
PB: predicated region body
PF: predicated region fallthrough
CT: control target
= control target key end

     0   :  { %s1285_s0 = inlined_call_operand.vmem [shape: s32[2], index: 0, kind: input, shape index: {}]   ;;  %s1286_s3 = inlined_call_operand.vmem [shape: f32[8,32], index: 3, kind: input, shape index: {}]   ;;  %s1287_s4 = inlined_call_operand.vmem [shape: f32[32,8], index: 4, kind: input, shape index: {}]   ;;  %s1288_s5 = inlined_call_operand.vmem [shape: s32[8,1], index: 5, kind: input, shape index: {}]   ;;  %s1289_s6 = inlined_call_operand.vmem [shape: s32[1,8], index: 6, kind: input, shape index: {}]   ;;  %s1290_s7 = inlined_call_operand.vmem [shape: f32[2,1,1], index: 7, kind: output, shape index: {0}]   ;;  %s1291_s8 = inlined_call_operand.vmem [shape: f32[2,1,1], index: 8, kind: output, shape index: {1}]   ;;  %s1292_s9 = inlined_call_operand.vmem [shape: f32[2,1,1], index: 9, kind: output, shape index: {2}]   ;;  %s1293_s10 = inlined_call_operand.vmem [shape: f32[2,1,1], index: 10, kind: output, shape index: {3}]   ;;  %s1294_s1 = inlined_call_operand.vmem [shape: s32[2], index: 1, kind: input, shape index: {}]   ;;  %s1295_s2 = inlined_call_operand.vmem [shape: s32[2], index: 2, kind: input, shape index: {}]  }
   0x1   :  { %s16_s15 = sshll.u32 %s1285_s0, 4  ;;  %s20_s18 = sshll.u32 %s1294_s1, 4  ;;  %s17_s15 = int_to_ptr.vmem [resolvable:$true] %s16_s15  ;;  %s21_s18 = int_to_ptr.vmem [resolvable:$true] %s20_s18 }
   0x2   :  { %s998_s19 = scalar_lea.vmem %s17_s15, 16  ;;  %p1003_p1 = scmp.lt.s32.totalorder %s17_s15, %s17_s15 }
   0x3   :  { %p999_p0 = scmp.ne.s32.totalorder %s17_s15, %s998_s19  ;;  %p1004_p2 = scmp.lt.s32.totalorder %s998_s19, %s998_s19 }
   0x5   :  { %p1005_p3 = por %p1004_p2, %p1003_p1 }
   0x7   :  { %p1006_p4 = pnand %p1005_p3, %p999_p0 }
   0x9   :  { %1009 = shalt.err (!%p1006_p4)  }
   0xa   :  { %s1060_s20 = smov [#allocation7]   ;;  %s1010_s21 = scalar_lea.vmem %s21_s18, 16 }
   0xb   :  { %19 = dma.vmem_to_smem %s17_s15, 16, %s1060_s20, [#allocation6] }
   0xc   :  { %p1011_p5 = scmp.ne.s32.totalorder %s21_s18, %s1010_s21  ;;  %p1015_p6 = scmp.lt.s32.totalorder %s21_s18, %s21_s18 }
   0xd   :  { %p1016_p7 = scmp.lt.s32.totalorder %s1010_s21, %s1010_s21 }
   0xf   :  { %p1017_p8 = por %p1016_p7, %p1015_p6 }
  0x11   :  { %p1018_p9 = pnand %p1017_p8, %p1011_p5 }
  0x13   :  { %1021 = shalt.err (!%p1018_p9)  }
  0x14   :  { %s1061_s0 = smov [#allocation8]   ;;  %s24_s23 = sshll.u32 %s1295_s2, 4  ;;  %s25_s23 = int_to_ptr.vmem [resolvable:$true] %s24_s23 }
  0x15   :  { %23 = dma.vmem_to_smem %s21_s18, 16, %s1061_s0, [#allocation6] }
  0x16   :  { %s1022_s24 = scalar_lea.vmem %s25_s23, 16  ;;  %p1027_p11 = scmp.lt.s32.totalorder %s25_s23, %s25_s23 }
  0x17   :  { %p1023_p10 = scmp.ne.s32.totalorder %s25_s23, %s1022_s24  ;;  %p1028_p12 = scmp.lt.s32.totalorder %s1022_s24, %s1022_s24 }
  0x19   :  { %p1029_p13 = por %p1028_p12, %p1027_p11 }
  0x1b   :  { %p1030_p0 = pnand %p1029_p13, %p1023_p10 }
  0x1d   :  { %1033 = shalt.err (!%p1030_p0)  }
  0x1e   :  { %s1062_s25 = smov [#allocation9]  }
  0x1f   :  { %27 = dma.vmem_to_smem %s25_s23, 16, %s1062_s25, [#allocation6] }
  0x20   :  { %1046 = dma.done.wait [#allocation6], 48 }
  0x21   :  { %1047 = vsyncadd [#allocation6], 4294967248 }
  0x22   :  { %29 = sfence }
  0x23   :  { %s1135_s26 = smov 0   ;;  %s1137_s27 = smov 0  }
  0x24   :  { %s1139_s28 = smov 0  }
  0x25 LB: > { %s47_s2 = sadd.s32 1, %s1054_s27  ;;  %p912_p1 = scmp.ge.s32.totalorder %s1058_s28, 1  ;;  %s1058_s28 = sphi %s1139_s28, %s35_s28   ;;  %s1054_s27 = sphi %s1137_s27, %s1299_s27   ;;  %s1050_s26 = sphi %s1135_s26, %s1298_s26  }
  0x26   : > { %p49_p2 = scmp.ge.s32.totalorder %s47_s2, 2  ;;  %p330_p3 = scmp.lt.s32.totalorder %s1058_s28, 3 }
  0x28   : > { %s1301_s2 = smov (%p49_p2, %s47_s2), 0  ;;  %p331_p4 = pnand %p912_p1, %p330_p3 }
  0x29   : > { %p418_p5 = scmp.lt.s32.totalorder (!%p331_p4), %s1050_s26, 1  ;;  %s1157_s29 = sld [smem:[#allocation9 + %s1050_s26]] (!%p331_p4)  ;;  %vm435_vm0 = vcmask (!%p331_p4), 0   ;;  %v1063_v0 = vmov (!%p331_p4), 0.0|0.0   ;;  %v1064_v1 = vmov (!%p331_p4), -1e+30  }
  0x2a   : > { %334 = sbr.rel (%p331_p4) target bundleno = 1242 (0x4da), region = 36  ;;  %940 = vmatprep.subr.bf16.mxu0 (!%p331_p4), %v1063_v0  ;;  %s396_s30 = sld [smem:[#allocation8 + %s1050_s26]] (!%p331_p4)  ;;  %436 = vst.msk [vmem:[#allocation2] sm:$0x1] (!%p331_p4), %vm435_vm0, %v1064_v1  ;;  %437 = vst.msk [vmem:[#allocation4] sm:$0x1] (!%p331_p4), %vm435_vm0, %v1064_v1 }
  0x2b   : > { %s388_s11 = sld [smem:[#allocation7 + %s1050_s26]] (!%p331_p4)  ;;  %v1065_v2 = vmov (!%p331_p4), 0.0   ;;  %vm1066_vm1 = vmmov (!%p331_p4), 0   ;;  %v1067_v3 = vmov (!%p331_p4), 0   ;;  %vm446_vm2 = vcmask (!%p331_p4), 261120  }
  0x2c   : > { %438 = vst.msk [vmem:[#allocation3] sm:$0x1] (!%p331_p4), %vm435_vm0, %v1065_v2  ;;  %439 = vst.msk [vmem:[#allocation5] sm:$0x1] (!%p331_p4), %vm435_vm0, %v1065_v2  ;;  %937 = vmatprep.mubr.msk.f32.mxu0 (!%p331_p4), %vm1066_vm1, %v1065_v2  ;;  %981 = vset.pattern.permute.xlu0 (!%p331_p4), %v1067_v3  ;;  %s404_s13 = sld [smem:[#allocation7 + %s1050_s26]] (!%p331_p4) }
  0x2d   : > { %v1068_v19 = vmov (!%p331_p4), 0.4  }
  0x2f   : > { %p918_p10 = scmp.ne.s32.totalorder (!%p331_p4), %s1157_s29, 0 }
  0x30   : > { %p397_p6 = scmp.lt.s32.totalorder (!%p331_p4), %s396_s30, 0 }
  0x31   : > { %s1164_s12 = scalar_select %p418_p5, %s1050_s26, 1 }
  0x32   : > { %p389_p7 = scmp.lt.s32.totalorder %s388_s11, 0  ;;  %s1303_s30 = smov (!%p397_p6, %s396_s30), 0  ;;  %vm548_vm4 = vcmask (!%p918_p10), 64512   ;;  %v1069_v32 = vmov (!%p918_p10), 0   ;;  %v570_v36 = vlaneseq (!%p918_p10)  ;;  %v546_v45 = vld [vmem:[#allocation2] sm:$0x1] (!%p918_p10) }
  0x33   : > { %s420_s16 = scalar_lea.vmem %s1290_s7, %s1164_s12  ;;  %s423_s19 = scalar_lea.vmem %s1291_s8, %s1164_s12  ;;  %982 = vset.pattern.permute.xlu1 (!%p918_p10), %v1069_v32  ;;  %v547_v51 = vld [vmem:[#allocation4] sm:$0x1] (!%p918_p10) }
  0x34   : > { %s426_s0 = scalar_lea.vmem %s1292_s9, %s1164_s12  ;;  %s429_s23 = scalar_lea.vmem %s1293_s10, %s1164_s12  ;;  %v571_v42 = vshrl.u32 (!%p918_p10), %v570_v36, 7 }
  0x35   : > { %s1305_s11 = smov (!%p389_p7, %s388_s11), 0  ;;  %s914_s24 = sshll.u32 %s1303_s30, 3 }
  0x36   : > { %p405_p8 = scmp.lt.s32.totalorder %s404_s13, 0  ;;  %s400_s15 = scalar_lea.vmem %s1287_s4, %s914_s24  ;;  %v572_v48 = vsub.s32 (!%p918_p10), 0, %v571_v42 }
  0x37   : > { %v442_v4 = vld [vmem:[%s400_s15] sm:$0xff]  ;;  %v443_v5 = vld [vmem:[%s400_s15 + $0x8] sm:$0xff]  ;;  %v444_v6 = vld [vmem:[%s400_s15 + $0x10] sm:$0xff]  ;;  %s913_s17 = sshll.u32 %s1305_s11, 3  ;;  %s412_s11 = sld [smem:[#allocation8 + %s1050_s26]] }
  0x38   : > { %v941_v7 = vpack.c.bf16 %v443_v5, %v442_v4  ;;  %v445_v8 = vld [vmem:[%s400_s15 + $0x18] sm:$0xff]  ;;  %s1307_s13 = smov (!%p405_p8, %s404_s13), 0  ;;  %s392_s30 = scalar_lea.vmem %s1286_s3, %s913_s17 }
  0x39   : > { %v944_v9 = vpack.c.bf16 %v445_v8, %v444_v6  ;;  %s915_s18 = sshll.u32 %s1307_s13, 3  ;;  %v441_v11 = vld [vmem:[%s392_s30] sm:$0xff] }
  0x3a   : > { %942 = vmatpush3.bf16.msra.mxu0 %v941_v7  ;;  %s408_s24 = scalar_lea.vmem %s1288_s5, %s915_s18 }
  0x3b   : > { %943 = vmatprep.subr.bf16.mxu0 %v1063_v0  ;;  %v520_v10 = vld [vmem:[%s408_s24] sm:$0xff] }
  0x3c   : > { %523 = vperm.xlu0 %981, %v520_v10  }
  0x3d   : > { %p413_p9 = scmp.lt.s32.totalorder %s412_s11, 0 }
  0x3e   : > { %945 = vmatpush3.bf16.msra.mxu0 %v944_v9 }
  0x3f   : > { %s1309_s11 = smov (!%p413_p9, %s412_s11), 0 }
  0x40   : > { %s415_s14 = scalar_lea.vmem %s1289_s6, %s1309_s11  ;;  %983 = vset.pattern.permute.xlu0 (!%p918_p10), %v1069_v32 }
  0x41   : > { %938 = vmatmul.mubr.msk.f32.vlgmr.msra.gmra.mrb[0].mxu0 %vm446_vm2, %v441_v11  ;;  %v917_v12 = vld [vmem:[%s415_s14] ss:$0 sm:$0xff] }
  0xbb   : > { %v524_v13 = vpop.permute.xlu0 %523 }
  0xbc   : > { %vm1198_vm3 = vcmp.eq.s32.totalorder %v524_v13, %v917_v12 }
  0xbd   : > { %v537_v20 = vsel %vm1198_vm3, 0.6, %v1068_v19  ;;  %v619_v19 = vld [vmem:[#allocation5] sm:$0x1] (!%p918_p10) }
 0x114   : > { %v516_v15 = vpop.f32.mrb[0].mxu0 }
 0x115   : > { %v530_v16 = vsub.f32 1.4, %v516_v15  ;;  %v532_v17 = vadd.f32 0.4, %v516_v15  ;;  %v939_v18 = vpop.f32.mrb[1].mxu0  ;;  %v538_v25 = vsub.f32 %v516_v15, %v537_v20 }
 0x116   : > { %543 = sbr.rel (%p918_p10) target bundleno = 753 (0x2f1), region = 44  ;;  %v611_v20 = vld [vmem:[#allocation3] sm:$0x1] (!%p918_p10) }
 0x117   : > { %v531_v21 = vmax.f32 %v530_v16, 0.0  ;;  %v533_v22 = vmax.f32 %v532_v17, 0.0 }
 0x119   : > { %v534_v23 = vmul.f32 -80.0, %v531_v21  ;;  %v535_v24 = vmul.f32 80.0, %v533_v22 }
 0x11b   : > { %v536_v26 = vsel %vm1198_vm3, %v534_v23, %v535_v24 }
 0x11c   : > { %v1206_v27 = vmul.f32 %v538_v25, %v536_v26 }
 0x11e   : > { %v544_v28 = vsel %vm1198_vm3, %v1206_v27, -1e+30  ;;  %v545_v29 = vsel %vm1198_vm3, -1e+30, %v1206_v27 }
 0x11f   : > { %v549_v30 = vsel %vm548_vm4, %v544_v28, -inf  ;;  %v558_v31 = vsel %vm548_vm4, %v545_v29, -inf }
 0x120   : > { %550 = vmax.xlane.f32.xlu0 %v549_v30 }
 0x124   : > { %559 = vmax.xlane.f32.xlu0 %v558_v31 }
 0x1ad   : > { %v551_v33 = vpop.xlane.xlu0 %550 }
 0x1ae   : > { %v552_v34 = vrot.slane %v551_v33, 4 }
 0x1b0   : > { %v553_v35 = vmax.f32 %v551_v33, %v552_v34 }
 0x1b1   : > { %v560_v37 = vpop.xlane.xlu0 %559 }
 0x1b2   : > { %v554_v38 = vrot.slane %v553_v35, 2  ;;  %v561_v39 = vrot.slane %v560_v37, 4 }
 0x1b4   : > { %v555_v40 = vmax.f32 %v553_v35, %v554_v38  ;;  %v562_v41 = vmax.f32 %v560_v37, %v561_v39 }
 0x1b6   : > { %v556_v43 = vrot.slane %v555_v40, 1  ;;  %v563_v44 = vrot.slane %v562_v41, 2 }
 0x1b8   : > { %v557_v46 = vmax.f32 %v555_v40, %v556_v43  ;;  %v564_v47 = vmax.f32 %v562_v41, %v563_v44 }
 0x1ba   : > { %v565_v49 = vrot.slane %v564_v47, 1  ;;  %v567_v50 = vmax.f32 %v546_v45, %v557_v46 }
 0x1bc   : > { %v566_v52 = vmax.f32 %v564_v47, %v565_v49  ;;  %v573_v53 = vrot.slane %v567_v50, %v572_v48  ;;  %v612_v54 = vsub.f32 %v546_v45, %v567_v50  ;;  %626 = vst.msk [vmem:[#allocation2] sm:$0x1] %vm435_vm0, %v567_v50 }
 0x1be   : > { %v568_v55 = vmax.f32 %v547_v51, %v566_v52  ;;  %575 = vperm.xlu1 %982, %v573_v53   ;;  %v613_v4 = vmul.f32 1.442695, %v612_v54 }
 0x1c0   : > { %v620_v56 = vsub.f32 %v547_v51, %v568_v55  ;;  %627 = vst.msk [vmem:[#allocation4] sm:$0x1] %vm435_vm0, %v568_v55  ;;  %v582_v57 = vrot.slane %v568_v55, %v572_v48 }
 0x1c2   : > { %584 = vperm.xlu1 %982, %v582_v57   ;;  %v621_v5 = vmul.f32 1.442695, %v620_v56 }
 0x23d   : > { %v576_v58 = vpop.permute.xlu1 %575 }
 0x241   : > { %v585_v59 = vpop.permute.xlu1 %584 }
 0x242   : > { %v587_v60 = vsel %vm1198_vm3, %v576_v58, %v585_v59 }
 0x243   : > { %v588_v61 = vsub.f32 %v1206_v27, %v587_v60 }
 0x245   : > { %v589_v62 = vmul.f32 1.442695, %v588_v61 }
 0x247   : > { %984 = vpow2.f32 %v589_v62 }
 0x248   : > { %986 = vpow2.f32 %v613_v4 }
 0x249   : > { %988 = vpow2.f32 %v621_v5 }
 0x251   : > { %v985_v63 = vpop.eup %984 }
 0x252   : > { %v601_v0 = vsel %vm1198_vm3, 0.0, %v985_v63  ;;  %v591_v1 = vsel %vm1198_vm3, %v985_v63, 0.0  ;;  %v987_v15 = vpop.eup %986 }
 0x253   : > { %v602_v2 = vsel %vm548_vm4, %v601_v0, 0.0  ;;  %v592_v3 = vsel %vm548_vm4, %v591_v1, 0.0  ;;  %v989_v18 = vpop.eup %988  ;;  %v615_v25 = vmul.f32 %v987_v15, %v611_v20 }
 0x254   : > { %603 = vadd.xlane.f32.xlu1 %v602_v2  ;;  %593 = vadd.xlane.f32.xlu0 %v592_v3  ;;  %v623_v23 = vmul.f32 %v989_v18, %v619_v19 }
 0x2e1   : > { %v604_v6 = vpop.xlane.xlu1 %603  ;;  %v594_v7 = vpop.xlane.xlu0 %593 }
 0x2e2   : > { %v605_v8 = vrot.slane %v604_v6, 4  ;;  %v595_v9 = vrot.slane %v594_v7, 4 }
 0x2e4   : > { %v606_v10 = vadd.f32 %v605_v8, %v604_v6  ;;  %v596_v11 = vadd.f32 %v595_v9, %v594_v7 }
 0x2e6   : > { %v607_v12 = vrot.slane %v606_v10, 2  ;;  %v597_v13 = vrot.slane %v596_v11, 2 }
 0x2e8   : > { %v608_v16 = vadd.f32 %v607_v12, %v606_v10  ;;  %v598_v17 = vadd.f32 %v597_v13, %v596_v11 }
 0x2ea   : > { %v609_v21 = vrot.slane %v608_v16, 1  ;;  %v599_v22 = vrot.slane %v598_v17, 1 }
 0x2ec   : > { %v610_v24 = vadd.f32 %v609_v21, %v608_v16  ;;  %v600_v26 = vadd.f32 %v599_v22, %v598_v17 }
 0x2ee   : > { %v624_v28 = vadd.f32 %v623_v23, %v610_v24  ;;  %v616_v29 = vadd.f32 %v615_v25, %v600_v26 }
 0x2f0   : > { %625 = vst.msk [vmem:[#allocation5] sm:$0x1] %vm435_vm0, %v624_v28  ;;  %618 = vst.msk [vmem:[#allocation3] sm:$0x1] %vm435_vm0, %v616_v29 }
 0x2f1 PF: > { %p919_p11 = scmp.ne.s32.totalorder %s1157_s29, 1 }
 0x2f2   : > { %s632_s15 = sld [smem:[#allocation7 + %s1050_s26]] (!%p919_p11)  ;;  %v638_v30 = vlaneseq (!%p919_p11)  ;;  %vm653_vm8 = vcmask (!%p919_p11), 64512   ;;  %v1070_v41 = vmov (!%p919_p11), 0   ;;  %v651_v51 = vld [vmem:[#allocation2] sm:$0x1] (!%p919_p11) }
 0x2f3   : > { %631 = sbr.rel (%p919_p11) target bundleno = 1234 (0x4d2), region = 48  ;;  %s633_s17 = sld [smem:[#allocation8 + %s1050_s26]] (!%p919_p11)  ;;  %990 = vset.pattern.permute.xlu1 (!%p919_p11), %v1070_v41  ;;  %991 = vset.pattern.permute.xlu0 (!%p919_p11), %v1070_v41  ;;  %v652_v57 = vld [vmem:[#allocation4] sm:$0x1] (!%p919_p11) }
 0x2f4   : > { %v639_v31 = vshrl.u32 (!%p919_p11), %v638_v30, 7  ;;  %v641_v32 = vand.u32 (!%p919_p11), 127, %v638_v30 }
 0x2f6   : > { %v642_v33 = vsub.s32 (!%p919_p11), %v641_v32, %v639_v31  ;;  %v677_v54 = vsub.s32 (!%p919_p11), 0, %v639_v31 }
 0x2f7   : > { %v724_v24 = vld [vmem:[#allocation5] sm:$0x1] (!%p919_p11)  ;;  %v716_v25 = vld [vmem:[#allocation3] sm:$0x1] (!%p919_p11) }
 0x2f8   : > { %s920_s18 = sshll.u32 (!%p919_p11), %s632_s15, 3 }
 0x2f9   : > { %s921_s20 = sshll.u32 (!%p919_p11), %s633_s17, 3 }
 0x2fa   : > { %s636_s21 = ssub.s32 %s920_s18, %s921_s20  ;;  %s637_s30 = ssub.s32 8, %s921_s20 }
 0x2fb   : > { %v643_v34 = vstv %s636_s21  ;;  %v645_v35 = vstv %s637_s30 }
 0x2fc   : > { %vm644_vm5 = vcmp.gt.s32.totalorder %v642_v33, %v643_v34  ;;  %vm646_vm6 = vcmp.lt.s32.totalorder %v641_v32, %v645_v35 }
 0x2fd   : > { %vm647_vm7 = vmand %vm644_vm5, %vm646_vm6 }
 0x2fe   : > { %v648_v36 = vsel %vm647_vm7, %v1206_v27, -1e+30 }
 0x2ff   : > { %v649_v37 = vsel %vm1198_vm3, %v648_v36, -1e+30  ;;  %v650_v38 = vsel %vm1198_vm3, -1e+30, %v648_v36 }
 0x300   : > { %v654_v39 = vsel %vm653_vm8, %v649_v37, -inf  ;;  %v663_v40 = vsel %vm653_vm8, %v650_v38, -inf }
 0x301   : > { %655 = vmax.xlane.f32.xlu0 %v654_v39 }
 0x305   : > { %664 = vmax.xlane.f32.xlu0 %v663_v40 }
 0x38e   : > { %v656_v42 = vpop.xlane.xlu0 %655 }
 0x38f   : > { %v657_v43 = vrot.slane %v656_v42, 4 }
 0x391   : > { %v658_v44 = vmax.f32 %v656_v42, %v657_v43 }
 0x392   : > { %v665_v45 = vpop.xlane.xlu0 %664 }
 0x393   : > { %v659_v27 = vrot.slane %v658_v44, 2  ;;  %v666_v46 = vrot.slane %v665_v45, 4 }
 0x395   : > { %v660_v47 = vmax.f32 %v658_v44, %v659_v27  ;;  %v667_v48 = vmax.f32 %v665_v45, %v666_v46 }
 0x397   : > { %v661_v49 = vrot.slane %v660_v47, 1  ;;  %v668_v50 = vrot.slane %v667_v48, 2 }
 0x399   : > { %v662_v52 = vmax.f32 %v660_v47, %v661_v49  ;;  %v669_v53 = vmax.f32 %v667_v48, %v668_v50 }
 0x39b   : > { %v670_v55 = vrot.slane %v669_v53, 1  ;;  %v672_v56 = vmax.f32 %v651_v51, %v662_v52 }
 0x39d   : > { %v671_v58 = vmax.f32 %v669_v53, %v670_v55  ;;  %v678_v59 = vrot.slane %v672_v56, %v677_v54  ;;  %v717_v60 = vsub.f32 %v651_v51, %v672_v56  ;;  %731 = vst.msk [vmem:[#allocation2] sm:$0x1] %vm435_vm0, %v672_v56 }
 0x39f   : > { %v673_v61 = vmax.f32 %v652_v57, %v671_v58  ;;  %680 = vperm.xlu1 %990, %v678_v59   ;;  %v718_v10 = vmul.f32 1.442695, %v717_v60 }
 0x3a1   : > { %v725_v62 = vsub.f32 %v652_v57, %v673_v61  ;;  %732 = vst.msk [vmem:[#allocation4] sm:$0x1] %vm435_vm0, %v673_v61  ;;  %v687_v63 = vrot.slane %v673_v61, %v677_v54 }
 0x3a3   : > { %689 = vperm.xlu1 %990, %v687_v63   ;;  %v726_v11 = vmul.f32 1.442695, %v725_v62 }
 0x41e   : > { %v681_v0 = vpop.permute.xlu1 %680 }
 0x422   : > { %v690_v1 = vpop.permute.xlu1 %689 }
 0x423   : > { %v692_v2 = vsel %vm1198_vm3, %v681_v0, %v690_v1 }
 0x424   : > { %v693_v3 = vsub.f32 %v648_v36, %v692_v2 }
 0x426   : > { %v694_v4 = vmul.f32 1.442695, %v693_v3 }
 0x428   : > { %992 = vpow2.f32 %v694_v4 }
 0x429   : > { %994 = vpow2.f32 %v718_v10 }
 0x42a   : > { %996 = vpow2.f32 %v726_v11 }
 0x432   : > { %v993_v5 = vpop.eup %992 }
 0x433   : > { %v706_v6 = vsel %vm1198_vm3, 0.0, %v993_v5  ;;  %v696_v7 = vsel %vm1198_vm3, %v993_v5, 0.0  ;;  %v995_v14 = vpop.eup %994 }
 0x434   : > { %v707_v8 = vsel %vm653_vm8, %v706_v6, 0.0  ;;  %v697_v9 = vsel %vm653_vm8, %v696_v7, 0.0  ;;  %v997_v23 = vpop.eup %996  ;;  %v720_v31 = vmul.f32 %v995_v14, %v716_v25 }
 0x435   : > { %708 = vadd.xlane.f32.xlu1 %v707_v8  ;;  %698 = vadd.xlane.f32.xlu0 %v697_v9  ;;  %v728_v29 = vmul.f32 %v997_v23, %v724_v24 }
 0x4c2   : > { %v709_v12 = vpop.xlane.xlu1 %708  ;;  %v699_v13 = vpop.xlane.xlu0 %698 }
 0x4c3   : > { %v710_v15 = vrot.slane %v709_v12, 4  ;;  %v700_v16 = vrot.slane %v699_v13, 4 }
 0x4c5   : > { %v711_v17 = vadd.f32 %v710_v15, %v709_v12  ;;  %v701_v18 = vadd.f32 %v700_v16, %v699_v13 }
 0x4c7   : > { %v712_v19 = vrot.slane %v711_v17, 2  ;;  %v702_v20 = vrot.slane %v701_v18, 2 }
 0x4c9   : > { %v713_v21 = vadd.f32 %v712_v19, %v711_v17  ;;  %v703_v22 = vadd.f32 %v702_v20, %v701_v18 }
 0x4cb   : > { %v714_v26 = vrot.slane %v713_v21, 1  ;;  %v704_v28 = vrot.slane %v703_v22, 1 }
 0x4cd   : > { %v715_v30 = vadd.f32 %v714_v26, %v713_v21  ;;  %v705_v32 = vadd.f32 %v704_v28, %v703_v22 }
 0x4cf   : > { %v729_v33 = vadd.f32 %v728_v29, %v715_v30  ;;  %v721_v34 = vadd.f32 %v720_v31, %v705_v32 }
 0x4d1   : > { %730 = vst.msk [vmem:[#allocation5] sm:$0x1] %vm435_vm0, %v729_v33  ;;  %723 = vst.msk [vmem:[#allocation3] sm:$0x1] %vm435_vm0, %v721_v34 }
 0x4d2 PF: > { %v736_v35 = vld [vmem:[#allocation2] sm:$0x1]  ;;  %v741_v37 = vld [vmem:[#allocation4] sm:$0x1] }
 0x4d3   : > { %738 = vst.msk [vmem:[%s420_s16] sm:$0x1] %vm435_vm0, %v736_v35  ;;  %742 = vst.msk [vmem:[%s426_s0] sm:$0x1] %vm435_vm0, %v741_v37 }
 0x4d8   : > { %v739_v36 = vld [vmem:[#allocation3] sm:$0x1]  ;;  %v743_v38 = vld [vmem:[#allocation5] sm:$0x1] }
 0x4d9   : > { %740 = vst.msk [vmem:[%s423_s19] sm:$0x1] %vm435_vm0, %v739_v36  ;;  %744 = vst.msk [vmem:[%s429_s23] sm:$0x1] %vm435_vm0, %v743_v38 }
 0x4da PF: > { %s35_s28 = sadd.s32 1, %s1058_s28   ;;  %s1298_s26 = smov %s1054_s27 }
 0x4db   : > { %p32_p12 = scmp.ge.s32.totalorder %s35_s28, 4   ;;  %s1299_s27 = smov %s1301_s2 }
 0x4dd   :  { %34 = sbr.rel (!%p32_p12) target bundleno = 37 (0x25), region = 127 }

</bundles_post_ra>
